<compile_context>
chip_gen: v6e
topology: v6e:2x2x1
jax: 0.10.0
libtpu: 0.0.40
codegen_flags: <defaults>
</compile_context>

<pallas_src>
import jax
import jax.numpy as jnp
from jax.experimental import pallas as pl
from jax.experimental.pallas import tpu as pltpu


def _round_up(n, m):
    return ((n + m - 1) // m) * m


def _cdiv(a, b):
    return -(-a // b)


def mlp_kernel(xT_ref, w1_ref, b1_ref, w2_ref, b2_ref, w3_ref, b3_ref, oT_ref):
    # Feature-major layout: batch is the lane (last) dim everywhere.
    #   xT: (F, TB) bf16; w_i: PyTorch (out, in) bf16; b_i: (out, 1) f32; oT: (O, TB) f32
    xT = xT_ref[...]

    h1 = jnp.dot(w1_ref[...], xT, preferred_element_type=jnp.float32) + b1_ref[...]
    h1 = jax.nn.sigmoid(h1)                      # f32 activation math

    h2 = jnp.dot(w2_ref[...], h1.astype(jnp.bfloat16),
                 preferred_element_type=jnp.float32) + b2_ref[...]
    h2 = jax.nn.sigmoid(h2)

    out = jnp.dot(w3_ref[...], h2.astype(jnp.bfloat16),
                  preferred_element_type=jnp.float32) + b3_ref[...]
    oT_ref[...] = out.astype(oT_ref.dtype)       # lane-dense store: last dim = TB


def net_forward(x, w1, b1, w2, b2, w3, b3, *, block_batch=4096):
    """x: (batch, num_features); weights in PyTorch layout W_i = (out, in)."""
    batch, num_features = x.shape
    num_hidden = w1.shape[0]
    num_output = w3.shape[0]

    # One-time wrapper-side prep: bf16 weights in their native (out, in) layout,
    # (out, 1) f32 biases (broadcast over lanes inside the kernel), feature-major x.
    w1b = jnp.asarray(w1).astype(jnp.bfloat16)                    # (H, F)
    w2b = jnp.asarray(w2).astype(jnp.bfloat16)                    # (H, H)
    w3b = jnp.asarray(w3).astype(jnp.bfloat16)                    # (O, H)
    b1r = jnp.asarray(b1, jnp.float32).reshape(num_hidden, 1)
    b2r = jnp.asarray(b2, jnp.float32).reshape(num_hidden, 1)
    b3r = jnp.asarray(b3, jnp.float32).reshape(num_output, 1)
    xT = jnp.asarray(x).astype(jnp.bfloat16).T                    # (F, batch)

    if batch <= block_batch:
        # Single full-extent block: no padding, no alignment constraint, grid of 1.
        tb = batch
        padded_batch = batch
    else:
        # Even, balanced tile count (pairs shard across v7x's 2 TensorCores), tiles a
        # multiple of 128 lanes; padding bounded by ~128 * grid columns.
        n_tiles = 2 * _cdiv(batch, 2 * block_batch)
        tb = _round_up(_cdiv(batch, n_tiles), 128)
        padded_batch = _round_up(batch, tb)
        xT = jnp.pad(xT, ((0, 0), (0, padded_batch - batch)))
    grid = (padded_batch // tb,)

    resident = lambda shape: pl.BlockSpec(shape, lambda i: (0, 0))

    outT = pl.pallas_call(
        mlp_kernel,
        out_shape=jax.ShapeDtypeStruct((num_output, padded_batch), jnp.float32),
        grid_spec=pltpu.PrefetchScalarGridSpec(
            num_scalar_prefetch=0,
            grid=grid,
            in_specs=[
                pl.BlockSpec((num_features, tb), lambda i: (0, i)),   # x^T tile (pipelined)
                resident((num_hidden, num_features)),                 # W1
                resident((num_hidden, 1)),                            # b1
                resident((num_hidden, num_hidden)),                   # W2
                resident((num_hidden, 1)),                            # b2
                resident((num_output, num_hidden)),                   # W3
                resident((num_output, 1)),                            # b3
            ],
            out_specs=pl.BlockSpec((num_output, tb), lambda i: (0, i)),
        ),
        compiler_params=pltpu.CompilerParams(
            dimension_semantics=("parallel",),   # shards batch tiles across v7x's 2 TCs
        ),
    )(xT, w1b, b1r, w2b, b2r, w3b, b3r)

    return outT[:, :batch].T                                       # (batch, num_output)


def xavier_normal(key, out_dim, in_dim):
    # torch.nn.init.xavier_normal_: std = sqrt(2 / (fan_in + fan_out))
    std = (2.0 / (in_dim + out_dim)) ** 0.5
    return std * jax.random.normal(key, (out_dim, in_dim), dtype=jnp.float32)


def _reference(x, w1, b1, w2, b2, w3, b3):
    # Same numerics as the kernel: bf16 operands, f32 accumulation, f32 sigmoid.
    xb = x.astype(jnp.bfloat16).astype(jnp.float32)
    w1b = w1.astype(jnp.bfloat16).astype(jnp.float32)
    w2b = w2.astype(jnp.bfloat16).astype(jnp.float32)
    w3b = w3.astype(jnp.bfloat16).astype(jnp.float32)
    h = jax.nn.sigmoid(xb @ w1b.T + b1)
    h = h.astype(jnp.bfloat16).astype(jnp.float32)
    h = jax.nn.sigmoid(h @ w2b.T + b2)
    h = h.astype(jnp.bfloat16).astype(jnp.float32)
    return h @ w3b.T + b3


if __name__ == "__main__":
    num_features = 16
    num_hidden = 32
    num_output = 4
    batch = 8

    key = jax.random.PRNGKey(0)
    kx, k1, k2, k3, kmid, kbig = jax.random.split(key, 6)

    x = jax.random.normal(kx, (batch, num_features), dtype=jnp.float32)
    W1 = xavier_normal(k1, num_hidden, num_features)
    b1 = jnp.zeros((num_hidden,), dtype=jnp.float32)
    W2 = xavier_normal(k2, num_hidden, num_hidden)
    b2 = jnp.zeros((num_hidden,), dtype=jnp.float32)
    W3 = xavier_normal(k3, num_output, num_hidden)
    b3 = jnp.zeros((num_output,), dtype=jnp.float32)

    # Small-batch case (single full-extent block, no padding).
    out = net_forward(x, W1, b1, W2, b2, W3, b3)
    jax.block_until_ready(out)
    ref = _reference(x, W1, b1, W2, b2, W3, b3)
    assert out.shape == (batch, num_output)
    assert jnp.allclose(out, ref, atol=2e-3, rtol=2e-3), "mismatch vs reference (small batch)"

    # Non-aligned medium batch: still a single block, no wrapper-side pad.
    mid_batch = 1040
    x_mid = jax.random.normal(kmid, (mid_batch, num_features), dtype=jnp.float32)
    out_mid = net_forward(x_mid, W1, b1, W2, b2, W3, b3)
    jax.block_until_ready(out_mid)
    ref_mid = _reference(x_mid, W1, b1, W2, b2, W3, b3)
    assert out_mid.shape == (mid_batch, num_output)
    assert jnp.allclose(out_mid, ref_mid, atol=2e-3, rtol=2e-3), "mismatch vs reference (mid batch)"

    # Large batch: exercises the balanced even-grid tiled/parallel path.
    big_batch = 5000
    x_big = jax.random.normal(kbig, (big_batch, num_features), dtype=jnp.float32)
    out_big = net_forward(x_big, W1, b1, W2, b2, W3, b3)
    jax.block_until_ready(out_big)
    ref_big = _reference(x_big, W1, b1, W2, b2, W3, b3)
    assert out_big.shape == (big_batch, num_output)
    assert jnp.allclose(out_big, ref_big, atol=2e-3, rtol=2e-3), "mismatch vs reference (big batch)"

    print("KERNEL_OK")
</pallas_src>

<mosaic_0001>
module attributes {stable_mosaic.version = 11 : i64} {
  func.func @mlp_kernel(%arg0: i32, %arg1: memref<16x8xbf16, #tpu.memory_space<vmem>>, %arg2: memref<32x16xbf16, #tpu.memory_space<vmem>>, %arg3: memref<32x1xf32, #tpu.memory_space<vmem>>, %arg4: memref<32x32xbf16, #tpu.memory_space<vmem>>, %arg5: memref<32x1xf32, #tpu.memory_space<vmem>>, %arg6: memref<4x32xbf16, #tpu.memory_space<vmem>>, %arg7: memref<4x1xf32, #tpu.memory_space<vmem>>, %arg8: memref<4x8xf32, #tpu.memory_space<vmem>>) attributes {dimension_semantics = [#tpu.dimension_semantics<parallel>], iteration_bounds = array<i64: 1>, scalar_prefetch = 0 : i64, scratch_operands = 0 : i64, tpu.core_type = #tpu.core_type<tc>, window_params = [{transform_indices = @transform_0, window_bounds = array<i64: 16, 8>}, {pipeline_mode = #tpu.pipeline_mode<synchronous>, transform_indices = @transform_1, window_bounds = array<i64: 32, 16>}, {pipeline_mode = #tpu.pipeline_mode<synchronous>, transform_indices = @transform_2, window_bounds = array<i64: 32, 1>}, {pipeline_mode = #tpu.pipeline_mode<synchronous>, transform_indices = @transform_3, window_bounds = array<i64: 32, 32>}, {pipeline_mode = #tpu.pipeline_mode<synchronous>, transform_indices = @transform_4, window_bounds = array<i64: 32, 1>}, {pipeline_mode = #tpu.pipeline_mode<synchronous>, transform_indices = @transform_5, window_bounds = array<i64: 4, 32>}, {pipeline_mode = #tpu.pipeline_mode<synchronous>, transform_indices = @transform_6, window_bounds = array<i64: 4, 1>}, {transform_indices = @transform_7, window_bounds = array<i64: 4, 8>}]} {
    %c0 = arith.constant 0 : index
    %c0_0 = arith.constant 0 : index
    %0 = vector.load %arg1[%c0, %c0_0] : memref<16x8xbf16, #tpu.memory_space<vmem>>, vector<16x8xbf16>
    %c0_1 = arith.constant 0 : index
    %c0_2 = arith.constant 0 : index
    %1 = vector.load %arg2[%c0_1, %c0_2] : memref<32x16xbf16, #tpu.memory_space<vmem>>, vector<32x16xbf16>
    %cst = arith.constant dense<0.000000e+00> : vector<32x8xf32>
    %2 = tpu.matmul %1, %0, %cst {dimension_numbers = #tpu.dot_dimension_numbers<[1], [0], [0], [1], [0, 0, 1, 1], [], []>} : vector<32x16xbf16>, vector<16x8xbf16>, vector<32x8xf32> -> vector<32x8xf32>
    %c0_3 = arith.constant 0 : index
    %c0_4 = arith.constant 0 : index
    %3 = vector.load %arg3[%c0_3, %c0_4] : memref<32x1xf32, #tpu.memory_space<vmem>>, vector<32x1xf32>
    %4 = vector.broadcast %3 : vector<32x1xf32> to vector<32x8xf32>
    %5 = arith.addf %2, %4 : vector<32x8xf32>
    %6 = arith.negf %5 : vector<32x8xf32>
    %7 = math.exp %6 : vector<32x8xf32>
    %cst_5 = arith.constant 1.000000e+00 : f32
    %8 = vector.broadcast %cst_5 : f32 to vector<32x8xf32>
    %9 = arith.addf %8, %7 : vector<32x8xf32>
    %10 = arith.divf %8, %9 : vector<32x8xf32>
    %c0_6 = arith.constant 0 : index
    %c0_7 = arith.constant 0 : index
    %11 = vector.load %arg4[%c0_6, %c0_7] : memref<32x32xbf16, #tpu.memory_space<vmem>>, vector<32x32xbf16>
    %12 = arith.truncf %10 : vector<32x8xf32> to vector<32x8xbf16>
    %cst_8 = arith.constant dense<0.000000e+00> : vector<32x8xf32>
    %13 = tpu.matmul %11, %12, %cst_8 {dimension_numbers = #tpu.dot_dimension_numbers<[1], [0], [0], [1], [0, 0, 1, 1], [], []>} : vector<32x32xbf16>, vector<32x8xbf16>, vector<32x8xf32> -> vector<32x8xf32>
    %c0_9 = arith.constant 0 : index
    %c0_10 = arith.constant 0 : index
    %14 = vector.load %arg5[%c0_9, %c0_10] : memref<32x1xf32, #tpu.memory_space<vmem>>, vector<32x1xf32>
    %15 = vector.broadcast %14 : vector<32x1xf32> to vector<32x8xf32>
    %16 = arith.addf %13, %15 : vector<32x8xf32>
    %17 = arith.negf %16 : vector<32x8xf32>
    %18 = math.exp %17 : vector<32x8xf32>
    %cst_11 = arith.constant 1.000000e+00 : f32
    %19 = vector.broadcast %cst_11 : f32 to vector<32x8xf32>
    %20 = arith.addf %19, %18 : vector<32x8xf32>
    %21 = arith.divf %19, %20 : vector<32x8xf32>
    %c0_12 = arith.constant 0 : index
    %c0_13 = arith.constant 0 : index
    %22 = vector.load %arg6[%c0_12, %c0_13] : memref<4x32xbf16, #tpu.memory_space<vmem>>, vector<4x32xbf16>
    %23 = arith.truncf %21 : vector<32x8xf32> to vector<32x8xbf16>
    %cst_14 = arith.constant dense<0.000000e+00> : vector<4x8xf32>
    %24 = tpu.matmul %22, %23, %cst_14 {dimension_numbers = #tpu.dot_dimension_numbers<[1], [0], [0], [1], [0, 0, 1, 1], [], []>} : vector<4x32xbf16>, vector<32x8xbf16>, vector<4x8xf32> -> vector<4x8xf32>
    %c0_15 = arith.constant 0 : index
    %c0_16 = arith.constant 0 : index
    %25 = vector.load %arg7[%c0_15, %c0_16] : memref<4x1xf32, #tpu.memory_space<vmem>>, vector<4x1xf32>
    %26 = vector.broadcast %25 : vector<4x1xf32> to vector<4x8xf32>
    %27 = arith.addf %24, %26 : vector<4x8xf32>
    %c0_17 = arith.constant 0 : index
    %c0_18 = arith.constant 0 : index
    %28 = vector.load %arg8[%c0_17, %c0_18] : memref<4x8xf32, #tpu.memory_space<vmem>>, vector<4x8xf32>
    tpu.vector_store %arg8[%c0_17, %c0_18], %27 {strides = array<i32>} : memref<4x8xf32, #tpu.memory_space<vmem>>, vector<4x8xf32>,
    return
  }
  func.func @transform_0(%arg0: i32) -> (i32, i32) {
    %c0_i32 = arith.constant 0 : i32
    %c0_i32_0 = arith.constant 0 : i32
    return %c0_i32, %arg0 : i32, i32
  }
  func.func @transform_1(%arg0: i32) -> (i32, i32) {
    %c0_i32 = arith.constant 0 : i32
    %c0_i32_0 = arith.constant 0 : i32
    %c0_i32_1 = arith.constant 0 : i32
    return %c0_i32, %c0_i32_0 : i32, i32
  }
  func.func @transform_2(%arg0: i32) -> (i32, i32) {
    %c0_i32 = arith.constant 0 : i32
    %c0_i32_0 = arith.constant 0 : i32
    %c0_i32_1 = arith.constant 0 : i32
    return %c0_i32, %c0_i32_0 : i32, i32
  }
  func.func @transform_3(%arg0: i32) -> (i32, i32) {
    %c0_i32 = arith.constant 0 : i32
    %c0_i32_0 = arith.constant 0 : i32
    %c0_i32_1 = arith.constant 0 : i32
    return %c0_i32, %c0_i32_0 : i32, i32
  }
  func.func @transform_4(%arg0: i32) -> (i32, i32) {
    %c0_i32 = arith.constant 0 : i32
    %c0_i32_0 = arith.constant 0 : i32
    %c0_i32_1 = arith.constant 0 : i32
    return %c0_i32, %c0_i32_0 : i32, i32
  }
  func.func @transform_5(%arg0: i32) -> (i32, i32) {
    %c0_i32 = arith.constant 0 : i32
    %c0_i32_0 = arith.constant 0 : i32
    %c0_i32_1 = arith.constant 0 : i32
    return %c0_i32, %c0_i32_0 : i32, i32
  }
  func.func @transform_6(%arg0: i32) -> (i32, i32) {
    %c0_i32 = arith.constant 0 : i32
    %c0_i32_0 = arith.constant 0 : i32
    %c0_i32_1 = arith.constant 0 : i32
    return %c0_i32, %c0_i32_0 : i32, i32
  }
  func.func @transform_7(%arg0: i32) -> (i32, i32) {
    %c0_i32 = arith.constant 0 : i32
    %c0_i32_0 = arith.constant 0 : i32
    return %c0_i32, %arg0 : i32, i32
  }
}

</mosaic_0001>

<bundles_post_ra>
// kernel: tpu_custom_call.1
= control target key start
LH: loop header
LB: loop body
LE: loop exit
PB: predicated region body
PF: predicated region fallthrough
CT: control target
= control target key end

     0   :  { %vm74_vm0 = vcmask 130048   ;;  %v457_v3 = vmov 0   ;;  %s552_s0 = inlined_call_operand.vmem [shape: bf16[16,8], index: 0, kind: input, shape index: {}]   ;;  %s553_s1 = inlined_call_operand.vmem [shape: bf16[32,16], index: 1, kind: input, shape index: {}]   ;;  %s554_s2 = inlined_call_operand.vmem [shape: f32[32,1], index: 2, kind: input, shape index: {}]   ;;  %s555_s3 = inlined_call_operand.vmem [shape: bf16[32,32], index: 3, kind: input, shape index: {}]   ;;  %s556_s4 = inlined_call_operand.vmem [shape: f32[32,1], index: 4, kind: input, shape index: {}]   ;;  %s557_s5 = inlined_call_operand.vmem [shape: bf16[4,32], index: 5, kind: input, shape index: {}]   ;;  %s558_s6 = inlined_call_operand.vmem [shape: f32[4,1], index: 6, kind: input, shape index: {}]   ;;  %s559_s7 = inlined_call_operand.hbm [shape: f32[4,8], index: 7, kind: output, shape index: {}]  }
   0x1   :  { %v398_v0 = vld [vmem:[%s552_s0] sm:$0xff]   ;;  %v400_v2 = vld [vmem:[%s553_s1 + $0x8] sm:$0xff]   ;;  %396 = vset.pattern.permute.xlu0 %v457_v3  ;;  %v36_v4 = vld [vmem:[%s554_s2 + $0x10] sm:$0xff]  ;;  %397 = vset.pattern.permute.xlu1 %v457_v3 }
   0x2   :  { %v399_v1 = vld [vmem:[%s553_s1] sm:$0xff]   ;;  %370 = vmatprep.subr.bf16.mxu0 %v398_v0  ;;  %50 = vperm.xlu0 %396, %v36_v4   ;;  %v37_v6 = vld [vmem:[%s554_s2 + $0x18] sm:$0xff]  ;;  %v35_v7 = vld [vmem:[%s554_s2 + $0x8] sm:$0xff] }
   0x3   :  { %371 = vmatpush3.bf16.msra.mxu0 %v398_v0  ;;  %372 = vmatprep.mubr.msk.bf16.mxu0 %vm74_vm0, %v399_v1  ;;  %v34_v5 = vld [vmem:[%s554_s2] sm:$0xff] }
   0x4   :  { %40 = vperm.xlu1 %397, %v34_v5  }
   0x6   :  { %373 = vmatmul.mubr.msk.bf16.vlgmr.msra.gmra.mxu0 %vm74_vm0, %v400_v2 }
   0x7   :  { %12 = vsyncpa [#allocation3], 0  ;;  %55 = vperm.xlu0 %396, %v37_v6   ;;  %v162_v8 = vld [vmem:[%s556_s4 + $0x10] sm:$0xff]  ;;  %v163_v9 = vld [vmem:[%s556_s4 + $0x18] sm:$0xff]  ;;  %vm194_vm1 = vcmask 261120   ;;  %v458_v45 = vmov 0.0  }
   0x8   :  { %45 = vperm.xlu1 %397, %v35_v7   ;;  %v160_v10 = vld [vmem:[%s556_s4] sm:$0xff]  ;;  %v161_v11 = vld [vmem:[%s556_s4 + $0x8] sm:$0xff]  ;;  %384 = vmatprep.subr.bf16.mxu0 %v458_v45  ;;  %vm459_vm2 = vmmov 0   ;;  %s460_s25 = smov [#allocation2]   ;;  %vm326_vm3 = vcmask 60416  }
   0x9   :  { %v277_v12 = vld [vmem:[%s558_s6] sm:$0xf]  ;;  %v402_v44 = vld [vmem:[%s555_s3 + $0x8] sm:$0xff]   ;;  %388 = vmatprep.mubr.msk.bf16.mxu0 %vm459_vm2, %v458_v45  ;;  %s334_s26 = sshll.u32 %s460_s25, 4  ;;  %s335_s26 = int_to_ptr.vmem [resolvable:$true] %s334_s26 }
   0xa   :  { %v401_v13 = vld [vmem:[%s555_s3] sm:$0xff]   ;;  %s435_s27 = scalar_lea.vmem %s335_s26, 64  ;;  %p440_p1 = scmp.lt.s32.totalorder %s335_s26, %s335_s26 }
   0xb   :  { %176 = vperm.xlu0 %396, %v162_v8   ;;  %380 = vmatprep.mubr.msk.bf16.mxu1 %vm194_vm1, %v401_v13  ;;  %p436_p0 = scmp.ne.s32.totalorder %s335_s26, %s435_s27  ;;  %p441_p2 = scmp.lt.s32.totalorder %s435_s27, %s435_s27 }
   0xc   :  { %181 = vperm.xlu1 %397, %v163_v9  }
   0xd   :  { %p442_p3 = por %p441_p2, %p440_p1 }
   0xf   :  { %166 = vperm.xlu0 %396, %v160_v10   ;;  %p443_p4 = pnand %p442_p3, %p436_p0 }
  0x10   :  { %171 = vperm.xlu1 %397, %v161_v11  }
  0x13   :  { %280 = vperm.xlu0 %396, %v277_v12   ;;  %v274_v12 = vld [vmem:[%s557_s5] sm:$0x3] }
  0x7d   :  { %v51_v14 = vpop.permute.xlu0 %50 }
  0x7f   :  { %v41_v15 = vpop.permute.xlu1 %40 }
  0x82   :  { %v56_v21 = vpop.permute.xlu0 %55 }
  0x83   :  { %v46_v25 = vpop.permute.xlu1 %45 }
  0x86   :  { %v177_v46 = vpop.permute.xlu0 %176 }
  0x87   :  { %v182_v47 = vpop.permute.xlu1 %181 }
  0x8a   :  { %v167_v50 = vpop.permute.xlu0 %166 }
  0x8b   :  { %v172_v57 = vpop.permute.xlu1 %171 }
  0x8e   :  { %v281_v13 = vpop.permute.xlu0 %280 }
  0xc6   :  { %v374_v16 = vpop.f32.mrf.mxu0 }
  0xc7   :  { %v124_v17 = vadd.f32 %v374_v16, %v51_v14 }
  0xc8   :  { %v115_v18 = vpop.f32.mrf.mxu0 }
  0xc9   :  { %v349_v19 = vmul.f32 -1.442695, %v124_v17  ;;  %v116_v20 = vadd.f32 %v115_v18, %v41_v15 }
  0xca   :  { %v375_v22 = vpop.f32.mrf.mxu0 }
  0xcb   :  { %403 = vpow2.f32 %v349_v19  ;;  %v347_v23 = vmul.f32 -1.442695, %v116_v20  ;;  %v127_v24 = vadd.f32 %v375_v22, %v56_v21 }
  0xcc   :  { %v118_v26 = vpop.f32.mrf.mxu0 }
  0xcd   :  { %405 = vpow2.f32 %v347_v23  ;;  %v350_v27 = vmul.f32 -1.442695, %v127_v24  ;;  %v119_v28 = vadd.f32 %v118_v26, %v46_v25 }
  0xcf   :  { %407 = vpow2.f32 %v350_v27  ;;  %v348_v29 = vmul.f32 -1.442695, %v119_v28 }
  0xd1   :  { %409 = vpow2.f32 %v348_v29 }
  0xd8   :  { %v404_v30 = vpop.eup %403 }
  0xd9   :  { %v144_v32 = vadd.f32 1.0, %v404_v30 }
  0xda   :  { %v406_v31 = vpop.eup %405 }
  0xdb   :  { %v142_v34 = vadd.f32 1.0, %v406_v31  ;;  %411 = vrcp.f32 %v144_v32 }
  0xdc   :  { %v408_v33 = vpop.eup %407 }
  0xdd   :  { %v145_v35 = vadd.f32 1.0, %v408_v33 }
  0xde   :  { %v410_v36 = vpop.eup %409 }
  0xdf   :  { %413 = vrcp.f32 %v145_v35  ;;  %v143_v37 = vadd.f32 1.0, %v410_v36 }
  0xe0   :  { %415 = vrcp.f32 %v142_v34 }
  0xe1   :  { %417 = vrcp.f32 %v143_v37 }
  0xe8   :  { %v412_v38 = vpop.eup %411 }
  0xec   :  { %v414_v39 = vpop.eup %413 }
  0xed   :  { %v416_v40 = vpop.eup %415  ;;  %v159_v41 = vpack.c.bf16 %v414_v39, %v412_v38 }
  0xee   :  { %v418_v42 = vpop.eup %417 }
  0xef   :  { %376 = vmatprep.subr.bf16.mxu1 %v159_v41  ;;  %v158_v43 = vpack.c.bf16 %v418_v42, %v416_v40 }
  0xf0   :  { %377 = vmatpush3.bf16.msra.mxu1 %v159_v41 }
  0xf1   :  { %378 = vmatprep.subr.bf16.mxu1 %v158_v43 }
  0xf4   :  { %379 = vmatpush3.bf16.msra.mxu1 %v158_v43 }
  0xf7   :  { %381 = vmatmul.mubr.msk.bf16.vlgmr.msra.gmra.mxu1 %vm194_vm1, %v402_v44 }
 0x1b7   :  { %v382_v48 = vpop.f32.mrf.mxu1 }
 0x1b8   :  { %v244_v49 = vadd.f32 %v382_v48, %v177_v46 }
 0x1b9   :  { %v235_v51 = vpop.f32.mrf.mxu1 }
 0x1ba   :  { %v357_v52 = vmul.f32 -1.442695, %v244_v49  ;;  %v236_v53 = vadd.f32 %v235_v51, %v167_v50 }
 0x1bb   :  { %v383_v54 = vpop.f32.mrf.mxu1 }
 0x1bc   :  { %419 = vpow2.f32 %v357_v52  ;;  %v355_v55 = vmul.f32 -1.442695, %v236_v53  ;;  %v247_v56 = vadd.f32 %v383_v54, %v182_v47 }
 0x1bd   :  { %v238_v58 = vpop.f32.mrf.mxu1 }
 0x1be   :  { %v358_v59 = vmul.f32 -1.442695, %v247_v56  ;;  %v239_v60 = vadd.f32 %v238_v58, %v172_v57  ;;  %421 = vpow2.f32 %v355_v55 }
 0x1c0   :  { %423 = vpow2.f32 %v358_v59  ;;  %v356_v61 = vmul.f32 -1.442695, %v239_v60 }
 0x1c2   :  { %425 = vpow2.f32 %v356_v61 }
 0x1c9   :  { %v420_v62 = vpop.eup %419 }
 0x1ca   :  { %v264_v63 = vadd.f32 1.0, %v420_v62 }
 0x1cb   :  { %v422_v0 = vpop.eup %421 }
 0x1cc   :  { %427 = vrcp.f32 %v264_v63  ;;  %v262_v4 = vadd.f32 1.0, %v422_v0 }
 0x1cd   :  { %v424_v1 = vpop.eup %423 }
 0x1ce   :  { %v265_v2 = vadd.f32 1.0, %v424_v1 }
 0x1cf   :  { %v426_v3 = vpop.eup %425 }
 0x1d0   :  { %429 = vrcp.f32 %v265_v2  ;;  %v263_v5 = vadd.f32 1.0, %v426_v3 }
 0x1d2   :  { %431 = vrcp.f32 %v263_v5 }
 0x1d3   :  { %433 = vrcp.f32 %v262_v4 }
 0x1d9   :  { %v428_v6 = vpop.eup %427 }
 0x1dd   :  { %v430_v7 = vpop.eup %429 }
 0x1de   :  { %v276_v8 = vpack.c.bf16 %v430_v7, %v428_v6 }
 0x1df   :  { %v432_v9 = vpop.eup %431 }
 0x1e0   :  { %385 = vmatpush3.bf16.msra.mxu0 %v276_v8  ;;  %v434_v10 = vpop.eup %433 }
 0x1e1   :  { %386 = vmatprep.subr.bf16.mxu0 %v458_v45  ;;  %v275_v11 = vpack.c.bf16 %v432_v9, %v434_v10 }
 0x1e4   :  { %387 = vmatpush3.bf16.msra.mxu0 %v275_v11 }
 0x1e7   :  { %389 = vmatmul.mubr.msk.bf16.vlgmr.msra.gmra.mxu0 %vm194_vm1, %v274_v12 }
 0x2a7   :  { %v320_v14 = vpop.f32.mrf.mxu0 }
 0x2a8   :  { %v321_v15 = vadd.f32 %v320_v14, %v281_v13 }
 0x2a9   :  { %v390_v16 = vpop.f32.mrf.mxu0 }
 0x2aa   :  { %327 = vst.msk [vmem:[#allocation2] sm:$0xf] %vm326_vm3, %v321_v15 }
 0x2ab   :  { %v323_v17 = vpop.f32.mrf.mxu0 }
 0x2ac   :  { %446 = shalt.err (!%p443_p4)
}
 0x2ad   :  { %337 = dma.vmem_to_hbm [thread:$0]  %s335_s26, 64, %s559_s7, [#allocation3]   ;;  %v391_v18 = vpop.f32.mrf.mxu0 }
 0x2ae   :  { %455 = dma.done.wait [#allocation3], 64  }
 0x2af   :  { %456 = vsyncadd [#allocation3], 4294967232 }
 0x2b0   :  { %341 = vsyncpa [#allocation3], 1 }

</bundles_post_ra>
